<compile_context>
chip_gen: v5e
topology: v5e:2x2
jax: 0.10.0
libtpu: 0.0.40
codegen_flags: <defaults>
</compile_context>

<pallas_src>
import functools

import jax
import jax.numpy as jnp
from jax import lax
from jax.experimental import pallas as pl
from jax.experimental.pallas import tpu as pltpu

_LANES = 128
_TILE_BUDGET = 12 * 1024 * 1024    # bytes for the double-buffered x/f/y column tile
_VMEM_LIMIT = 32 * 1024 * 1024     # scoped VMEM limit handed to Mosaic


def _fused_res_bn_kernel(x_ref, f_ref, gamma_ref, beta_ref, o_ref, *,
                         n_rows: int, eps: float):
    """y = gamma * (s - mean(s)) * rsqrt(var(s) + eps) + beta, with s = x + f.

    mean / var are per-feature (per-lane) statistics over all `n_rows` rows;
    the whole row extent is resident in this column block, so the reduction is
    a single in-VMEM sublane (XLU) reduction and rsqrt goes to the EUP slot.
    """
    s = x_ref[...].astype(jnp.float32) + f_ref[...].astype(jnp.float32)   # (N, tc)
    inv_n = jnp.float32(1.0 / n_rows)
    mean = jnp.sum(s, axis=0, keepdims=True) * inv_n                      # (1, tc)
    centered = s - mean
    var = jnp.sum(centered * centered, axis=0, keepdims=True) * inv_n     # biased, as in BN
    inv_std = lax.rsqrt(var + jnp.float32(eps))                           # EUP
    gamma = gamma_ref[...].astype(jnp.float32)                            # (1, tc)
    beta = beta_ref[...].astype(jnp.float32)
    o_ref[...] = (centered * (inv_std * gamma) + beta).astype(o_ref.dtype)


def _pick_col_tile(n_rows: int, n_cols: int, itemsize: int, col_tile=None) -> int:
    """Largest feature tile (multiple of 128, dividing C) whose x/f/y
    double-buffered footprint fits the VMEM budget. Non-128-multiple channel
    counts use a single full-width block (always a legal block shape)."""
    if col_tile is not None:
        assert col_tile % _LANES == 0 and n_cols % col_tile == 0
        return col_tile
    if n_cols % _LANES != 0:
        return n_cols
    budget_cols = max(_LANES, _TILE_BUDGET // max(6 * n_rows * itemsize, 1))
    tc = n_cols
    while tc > budget_cols and tc % 2 == 0 and (tc // 2) % _LANES == 0:
        tc //= 2
    return tc


def fused_residual_batchnorm(x: jax.Array, f: jax.Array,
                             gamma: jax.Array, beta: jax.Array,
                             *, eps: float = 1e-5, col_tile=None) -> jax.Array:
    """BatchNorm1d(training-mode) forward applied to (x + f), per node type."""
    assert x.ndim == 2 and x.shape == f.shape
    n, c = x.shape
    assert gamma.shape == (c,) and beta.shape == (c,)
    gamma2 = gamma.reshape(1, c)
    beta2 = beta.reshape(1, c)

    itemsize = jnp.dtype(x.dtype).itemsize
    tc = _pick_col_tile(n, c, itemsize, col_tile)
    grid = (pl.cdiv(c, tc),)

    kernel = functools.partial(_fused_res_bn_kernel, n_rows=n, eps=eps)
    return pl.pallas_call(
        kernel,
        out_shape=jax.ShapeDtypeStruct((n, c), x.dtype),
        grid_spec=pltpu.PrefetchScalarGridSpec(
            num_scalar_prefetch=0,
            grid=grid,
            in_specs=[
                pl.BlockSpec((n, tc), lambda j: (0, j)),   # x (all rows, col tile)
                pl.BlockSpec((n, tc), lambda j: (0, j)),   # f (conv output)
                pl.BlockSpec((1, tc), lambda j: (0, j)),   # gamma
                pl.BlockSpec((1, tc), lambda j: (0, j)),   # beta
            ],
            out_specs=pl.BlockSpec((n, tc), lambda j: (0, j)),
        ),
        compiler_params=pltpu.CompilerParams(
            dimension_semantics=("parallel",),
            vmem_limit_bytes=_VMEM_LIMIT,
        ),
    )(x, f, gamma2, beta2)


def _reference(x, f, gamma, beta, eps):
    s = x + f
    mean = s.mean(axis=0, keepdims=True)
    var = jnp.mean((s - mean) ** 2, axis=0, keepdims=True)   # biased, as in BN
    return (s - mean) / jnp.sqrt(var + eps) * gamma + beta


if __name__ == "__main__":
    key = jax.random.PRNGKey(0)
    keys = iter(jax.random.split(key, 32))
    eps = 1e-5

    # (node_count, channels, forced column tile) per case; mirrors the three
    # node types of ExtractLayer (operation / machine / AGV) plus two extra
    # shapes exercising multi-block feature tiling and non-128 channel widths.
    cases = {
        "operation": (24, 32, None),
        "machine": (8, 16, None),
        "AGV": (6, 16, None),
        "wide_tiled": (64, 256, 128),   # grid of 2 feature tiles
        "odd_width": (10, 200, None),   # full-width (non-128-multiple) block
    }

    for name, (n, c, ct) in cases.items():
        x = jax.random.normal(next(keys), (n, c), dtype=jnp.float32)
        f = jax.random.normal(next(keys), (n, c), dtype=jnp.float32)  # stands in for GATv2Conv output
        gamma = 1.0 + 0.1 * jax.random.normal(next(keys), (c,), dtype=jnp.float32)
        beta = 0.1 * jax.random.normal(next(keys), (c,), dtype=jnp.float32)

        y = fused_residual_batchnorm(x, f, gamma, beta, eps=eps, col_tile=ct)
        jax.block_until_ready(y)

        y_ref = _reference(x, f, gamma, beta, eps)
        assert y.shape == (n, c), name
        assert jnp.allclose(y, y_ref, atol=1e-4, rtol=1e-4), name

    print("KERNEL_OK")
</pallas_src>

<mosaic_0001>
module attributes {stable_mosaic.version = 11 : i64} {
  func.func @_fused_res_bn_kernel(%arg0: i32, %arg1: memref<24x32xf32, #tpu.memory_space<vmem>>, %arg2: memref<24x32xf32, #tpu.memory_space<vmem>>, %arg3: memref<1x32xf32, #tpu.memory_space<vmem>>, %arg4: memref<1x32xf32, #tpu.memory_space<vmem>>, %arg5: memref<24x32xf32, #tpu.memory_space<vmem>>) attributes {dimension_semantics = [#tpu.dimension_semantics<parallel>], iteration_bounds = array<i64: 1>, scalar_prefetch = 0 : i64, scratch_operands = 0 : i64, tpu.core_type = #tpu.core_type<tc>, window_params = [{transform_indices = @transform_0, window_bounds = array<i64: 24, 32>}, {transform_indices = @transform_1, window_bounds = array<i64: 24, 32>}, {transform_indices = @transform_2, window_bounds = array<i64: 1, 32>}, {transform_indices = @transform_3, window_bounds = array<i64: 1, 32>}, {transform_indices = @transform_4, window_bounds = array<i64: 24, 32>}]} {
    %c0 = arith.constant 0 : index
    %c0_0 = arith.constant 0 : index
    %0 = vector.load %arg1[%c0, %c0_0] : memref<24x32xf32, #tpu.memory_space<vmem>>, vector<24x32xf32>
    %c0_1 = arith.constant 0 : index
    %c0_2 = arith.constant 0 : index
    %1 = vector.load %arg2[%c0_1, %c0_2] : memref<24x32xf32, #tpu.memory_space<vmem>>, vector<24x32xf32>
    %2 = arith.addf %0, %1 : vector<24x32xf32>
    %cst = arith.constant dense<0.000000e+00> : vector<32xf32>
    %3 = vector.multi_reduction <add>, %2, %cst [0] : vector<24x32xf32> to vector<32xf32>
    %4 = vector.shape_cast %3 : vector<32xf32> to vector<1x32xf32>
    %cst_3 = arith.constant 0.0416666679 : f32
    %5 = vector.broadcast %cst_3 : f32 to vector<1x32xf32>
    %6 = arith.mulf %4, %5 : vector<1x32xf32>
    %7 = vector.broadcast %6 : vector<1x32xf32> to vector<24x32xf32>
    %8 = arith.subf %2, %7 : vector<24x32xf32>
    %9 = arith.mulf %8, %8 : vector<24x32xf32>
    %cst_4 = arith.constant dense<0.000000e+00> : vector<32xf32>
    %10 = vector.multi_reduction <add>, %9, %cst_4 [0] : vector<24x32xf32> to vector<32xf32>
    %11 = vector.shape_cast %10 : vector<32xf32> to vector<1x32xf32>
    %cst_5 = arith.constant 0.0416666679 : f32
    %12 = vector.broadcast %cst_5 : f32 to vector<1x32xf32>
    %13 = arith.mulf %11, %12 : vector<1x32xf32>
    %cst_6 = arith.constant 9.99999974E-6 : f32
    %14 = vector.broadcast %cst_6 : f32 to vector<1x32xf32>
    %15 = arith.addf %13, %14 : vector<1x32xf32>
    %16 = math.rsqrt %15 : vector<1x32xf32>
    %c0_7 = arith.constant 0 : index
    %c0_8 = arith.constant 0 : index
    %17 = vector.load %arg3[%c0_7, %c0_8] : memref<1x32xf32, #tpu.memory_space<vmem>>, vector<1x32xf32>
    %c0_9 = arith.constant 0 : index
    %c0_10 = arith.constant 0 : index
    %18 = vector.load %arg4[%c0_9, %c0_10] : memref<1x32xf32, #tpu.memory_space<vmem>>, vector<1x32xf32>
    %19 = arith.mulf %16, %17 : vector<1x32xf32>
    %20 = vector.broadcast %19 : vector<1x32xf32> to vector<24x32xf32>
    %21 = arith.mulf %8, %20 : vector<24x32xf32>
    %22 = vector.broadcast %18 : vector<1x32xf32> to vector<24x32xf32>
    %23 = arith.addf %21, %22 : vector<24x32xf32>
    %c0_11 = arith.constant 0 : index
    %c0_12 = arith.constant 0 : index
    %24 = vector.load %arg5[%c0_11, %c0_12] : memref<24x32xf32, #tpu.memory_space<vmem>>, vector<24x32xf32>
    tpu.vector_store %arg5[%c0_11, %c0_12], %23 {strides = array<i32>} : memref<24x32xf32, #tpu.memory_space<vmem>>, vector<24x32xf32>,
    return
  }
  func.func @transform_0(%arg0: i32) -> (i32, i32) {
    %c0_i32 = arith.constant 0 : i32
    %c0_i32_0 = arith.constant 0 : i32
    return %c0_i32, %arg0 : i32, i32
  }
  func.func @transform_1(%arg0: i32) -> (i32, i32) {
    %c0_i32 = arith.constant 0 : i32
    %c0_i32_0 = arith.constant 0 : i32
    return %c0_i32, %arg0 : i32, i32
  }
  func.func @transform_2(%arg0: i32) -> (i32, i32) {
    %c0_i32 = arith.constant 0 : i32
    %c0_i32_0 = arith.constant 0 : i32
    return %c0_i32, %arg0 : i32, i32
  }
  func.func @transform_3(%arg0: i32) -> (i32, i32) {
    %c0_i32 = arith.constant 0 : i32
    %c0_i32_0 = arith.constant 0 : i32
    return %c0_i32, %arg0 : i32, i32
  }
  func.func @transform_4(%arg0: i32) -> (i32, i32) {
    %c0_i32 = arith.constant 0 : i32
    %c0_i32_0 = arith.constant 0 : i32
    return %c0_i32, %arg0 : i32, i32
  }
}

</mosaic_0001>

<bundles_post_ra>
// kernel: tpu_custom_call.1
= control target key start
LH: loop header
LB: loop body
LE: loop exit
PB: predicated region body
PF: predicated region fallthrough
CT: control target
= control target key end

     0   :  { %9 = vsyncpa [#allocation3], 0  ;;  %s286_s0 = inlined_call_operand.hbm [shape: f32[24,32], index: 0, kind: input, shape index: {}]   ;;  %s287_s1 = inlined_call_operand.hbm [shape: f32[24,32], index: 1, kind: input, shape index: {}]   ;;  %s288_s2 = inlined_call_operand.vmem [shape: f32[1,32], index: 2, kind: input, shape index: {}]   ;;  %s289_s3 = inlined_call_operand.vmem [shape: f32[1,32], index: 3, kind: input, shape index: {}]   ;;  %s290_s4 = inlined_call_operand.hbm [shape: f32[24,32], index: 4, kind: output, shape index: {}]  }
   0x1   :  { %10 = vsyncpa [#allocation6], 0 }
   0x2   :  { %11 = vsyncpa [#allocation4], 0  ;;  %s16_s17 = sshll.u32 %s286_s0, 4  ;;  %s223_s18 = smov [#allocation2]   ;;  %s17_s17 = int_to_ptr.hbm [resolvable:$true] %s16_s17 }
   0x3   :  { %s18_s19 = sshll.u32 %s223_s18, 4  ;;  %s29_s22 = sshll.u32 %s287_s1, 4  ;;  %s19_s19 = int_to_ptr.vmem [resolvable:$true] %s18_s19  ;;  %s30_s22 = int_to_ptr.hbm [resolvable:$true] %s29_s22 }
   0x4   :  { %s224_s23 = smov 128   ;;  %s225_s24 = smov 8  }
   0x5   :  { %24 = dma.hbm_to_vmem [thread:$0]  %s17_s17, 384, %s19_s19, [#allocation3], %s224_s23, %s224_s23, %s225_s24  }
   0x6   :  { %s226_s25 = smov [#allocation5]  }
   0x7   :  { %s31_s26 = sshll.u32 %s226_s25, 4  ;;  %s32_s26 = int_to_ptr.vmem [resolvable:$true] %s31_s26 }
   0x8   :  { %37 = dma.hbm_to_vmem [thread:$0]  %s30_s22, 384, %s32_s26, [#allocation6], %s224_s23, %s224_s23, %s225_s24  }
   0x9   :  { %217 = dma.done.wait [#allocation3], 384  }
   0xa   :  { %218 = vsyncadd [#allocation3], 4294966912 }
   0xb   :  { %219 = dma.done.wait [#allocation6], 384  }
   0xc   :  { %220 = vsyncadd [#allocation6], 4294966912  ;;  %v50_v0 = vld [vmem:[#allocation2] sm:$0xff]  ;;  %v51_v1 = vld [vmem:[#allocation2 + $0x8] sm:$0xff]  ;;  %vm59_vm0 = vcmask 261120   ;;  %s227_s29 = smov [#allocation7]  }
   0xd   :  { %v52_v2 = vld [vmem:[#allocation2 + $0x10] sm:$0xff]  ;;  %v53_v3 = vld [vmem:[#allocation5] sm:$0xff]  ;;  %v54_v4 = vld [vmem:[#allocation5 + $0x8] sm:$0xff]  ;;  %s121_s30 = sshll.u32 %s227_s29, 4  ;;  %s123_s7 = sshll.u32 %s290_s4, 4  ;;  %s122_s30 = int_to_ptr.vmem [resolvable:$true] %s121_s30  ;;  %s124_s7 = int_to_ptr.hbm [resolvable:$true] %s123_s7 }
   0xe   :  { %v55_v5 = vld [vmem:[#allocation5 + $0x10] sm:$0xff]  ;;  %v56_v6 = vadd.f32 %v53_v3, %v50_v0  ;;  %v57_v7 = vadd.f32 %v54_v4, %v51_v1  ;;  %v101_v46 = vld [vmem:[%s288_s2] sm:$0x1] }
   0xf   :  { %v58_v8 = vadd.f32 %v55_v5, %v52_v2  ;;  %v142_v50 = vld [vmem:[%s289_s3] ss:$0 sm:$0xff] }
  0x10   :  { %v60_v9 = vsel %vm59_vm0, %v56_v6, 0.0  ;;  %v61_v10 = vsel %vm59_vm0, %v57_v7, 0.0 }
  0x11   :  { %v63_v11 = vsel %vm59_vm0, %v58_v8, 0.0  ;;  %v62_v12 = vadd.f32 %v61_v10, %v60_v9 }
  0x13   :  { %v64_v13 = vadd.f32 %v63_v11, %v62_v12 }
  0x15   :  { %v65_v14 = vrot.slane %v64_v13, 4 }
  0x17   :  { %v66_v15 = vadd.f32 %v65_v14, %v64_v13 }
  0x19   :  { %v67_v16 = vrot.slane %v66_v15, 2 }
  0x1b   :  { %v68_v17 = vadd.f32 %v67_v16, %v66_v15 }
  0x1d   :  { %v69_v18 = vrot.slane %v68_v17, 1 }
  0x1f   :  { %v70_v19 = vadd.f32 %v69_v18, %v68_v17 }
  0x21   :  { %v71_v20 = vmul.f32 0.041666668, %v70_v19 }
  0x23   :  { %v72_v21 = vsub.f32 %v56_v6, %v71_v20  ;;  %v73_v22 = vsub.f32 %v57_v7, %v71_v20  ;;  %v74_v23 = vsub.f32 %v58_v8, %v71_v20 }
  0x25   :  { %v75_v24 = vmul.f32 %v72_v21, %v72_v21  ;;  %v76_v25 = vmul.f32 %v73_v22, %v73_v22  ;;  %v77_v26 = vmul.f32 %v74_v23, %v74_v23 }
  0x27   :  { %v78_v27 = vsel %vm59_vm0, %v75_v24, 0.0  ;;  %v79_v28 = vsel %vm59_vm0, %v76_v25, 0.0  ;;  %v81_v29 = vsel %vm59_vm0, %v77_v26, 0.0 }
  0x28   :  { %v80_v30 = vadd.f32 %v79_v28, %v78_v27 }
  0x2a   :  { %v82_v31 = vadd.f32 %v81_v29, %v80_v30 }
  0x2c   :  { %v83_v32 = vrot.slane %v82_v31, 4 }
  0x2e   :  { %v84_v33 = vadd.f32 %v83_v32, %v82_v31 }
  0x30   :  { %v85_v34 = vrot.slane %v84_v33, 2 }
  0x32   :  { %v86_v35 = vadd.f32 %v85_v34, %v84_v33 }
  0x34   :  { %v87_v36 = vrot.slane %v86_v35, 1 }
  0x36   :  { %v88_v37 = vadd.f32 %v87_v36, %v86_v35 }
  0x38   :  { %v89_v38 = vmul.f32 0.041666668, %v88_v37 }
  0x3a   :  { %v90_v39 = vadd.f32 1e-05, %v89_v38 }
  0x3c   :  { %143 = vrsqrt.f32 %v90_v39  ;;  %vm97_vm1 = vweird.f32 %v90_v39 }
  0x42   :  { %v144_v40 = vpop.eup %143 }
  0x43   :  { %v92_v41 = vmul.f32 %v144_v40, %v90_v39  ;;  %vm98_vm2 = vweird.f32 %v144_v40 }
  0x44   :  { %vm99_vm3 = vmor %vm97_vm1, %vm98_vm2 }
  0x45   :  { %v93_v42 = vmul.f32 %v144_v40, %v92_v41 }
  0x47   :  { %v94_v43 = vmul.f32 0.5, %v93_v42 }
  0x49   :  { %v95_v44 = vsub.f32 1.5, %v94_v43 }
  0x4b   :  { %v96_v45 = vmul.f32 %v144_v40, %v95_v44 }
  0x4d   :  { %v100_v47 = vsel %vm99_vm3, %v144_v40, %v96_v45 }
  0x4e   :  { %v103_v48 = vmul.f32 %v101_v46, %v100_v47 }
  0x50   :  { %v104_v49 = vperm.slane %v103_v48, 0 }
  0x52   :  { %v105_v51 = vmul.f32 %v104_v49, %v72_v21  ;;  %v106_v52 = vmul.f32 %v104_v49, %v73_v22  ;;  %v107_v53 = vmul.f32 %v104_v49, %v74_v23 }
  0x54   :  { %v111_v54 = vadd.f32 %v142_v50, %v105_v51  ;;  %v112_v55 = vadd.f32 %v142_v50, %v106_v52  ;;  %v113_v56 = vadd.f32 %v142_v50, %v107_v53 }
  0x56   :  { %114 = vst.msk [vmem:[#allocation7] sm:$0xff] %vm59_vm0, %v111_v54 }
  0x57   :  { %115 = vst.msk [vmem:[#allocation7 + $0x8] sm:$0xff] %vm59_vm0, %v112_v55 }
  0x58   :  { %116 = vst.msk [vmem:[#allocation7 + $0x10] sm:$0xff] %vm59_vm0, %v113_v56 }
  0x59   :  { %129 = dma.vmem_to_hbm [thread:$0]  %s122_s30, 384, %s124_s7, [#allocation4], %s224_s23, %s224_s23, %s225_s24  }
  0x5a   :  { %221 = dma.done.wait [#allocation4], 384  }
  0x5b   :  { %222 = vsyncadd [#allocation4], 4294966912 }
  0x5c   :  { %134 = vsyncpa [#allocation3], 1 }
  0x5d   :  { %135 = vsyncpa [#allocation6], 1 }
  0x5e   :  { %136 = vsyncpa [#allocation4], 1 }

</bundles_post_ra>
